<compile_context>
chip_gen: v5e
topology: v5e:2x2
jax: 0.10.0
libtpu: 0.0.40
codegen_flags: <defaults>
</compile_context>

<pallas_src>
import functools

import jax
import jax.numpy as jnp
from jax.experimental import pallas as pl
from jax.experimental.pallas import tpu as pltpu

N_HIDDEN1 = 40
N_HIDDEN2 = 40
N_OUTPUT = 1

LANE = 128          # pad hidden feature dims (40) to one full lane width
DEFAULT_TB = 2048   # batch tile (rows per grid step)


def _mlp_kernel(x_ref, w1_ref, b1_ref, w2_ref, b2_ref, w3t_ref, b3_ref, o_ref):
    # Layer 1: (TB, n_in) @ (n_in, 128) + bias, ReLU.
    # Zero-padded weight columns + zero bias -> exact zeros after ReLU.
    h1 = jnp.dot(x_ref[...], w1_ref[...], preferred_element_type=jnp.float32)
    h1 = jnp.maximum(h1 + b1_ref[...], 0.0)
    # Layer 2: (TB, 128) @ (128, 128) + bias, ReLU.
    h2 = jnp.dot(h1, w2_ref[...], preferred_element_type=jnp.float32)
    h2 = jnp.maximum(h2 + b2_ref[...], 0.0)
    # Layer 3 (output width 1): VPU multiply by the broadcast w3 row + cross-lane
    # (XLU) sum -> (TB, 1). Padded h2 columns are exactly zero, padded w3 entries
    # are zero, so the sum equals the true 40-wide dot product.
    z = jnp.sum(h2 * w3t_ref[...], axis=-1, keepdims=True) + b3_ref[...]
    o_ref[...] = jax.nn.sigmoid(z).astype(o_ref.dtype)


def _round_up(n, m):
    return ((n + m - 1) // m) * m


def _pad_to(a, shape):
    pads = [(0, t - s) for s, t in zip(a.shape, shape)]
    return jnp.pad(a, pads)


def pad_params(w1, b1, w2, b2, w3, b3):
    """Zero-pad hidden dims to 128 lanes once (hoisted out of the hot path)."""
    n_in = w1.shape[0]
    w1p = _pad_to(w1.astype(jnp.float32), (n_in, LANE))
    b1p = _pad_to(b1.astype(jnp.float32).reshape(1, -1), (1, LANE))
    w2p = _pad_to(w2.astype(jnp.float32), (LANE, LANE))
    b2p = _pad_to(b2.astype(jnp.float32).reshape(1, -1), (1, LANE))
    w3tp = _pad_to(w3.astype(jnp.float32).T, (1, LANE))       # (40,1) -> (1,128)
    b3p = b3.astype(jnp.float32).reshape(1, 1)
    return w1p, b1p, w2p, b2p, w3tp, b3p


def _choose_tb(B, tb):
    """Pick the batch tile. Keep >= 2 grid steps (when B allows) so the
    'parallel' batch axis can be sharded across v7x's two TensorCores."""
    if B <= 16:
        return max(8, _round_up(B, 8))
    half = _round_up((B + 1) // 2, 8)
    return max(8, min(tb, half))


@functools.partial(jax.jit, static_argnames=("tb",))
def network_forward(x, w1p, b1p, w2p, b2p, w3tp, b3p, *, tb=DEFAULT_TB):
    """Pallas forward pass of the NetWork module.

    x : (B, n_input) float32
    padded params from pad_params().
    returns (B, 1) float32 in (0, 1)
    """
    B, n_in = x.shape
    TB = _choose_tb(B, tb)
    grid = (pl.cdiv(B, TB),)

    resident = lambda shape: pl.BlockSpec(shape, lambda i: (0, 0))

    return pl.pallas_call(
        _mlp_kernel,
        out_shape=jax.ShapeDtypeStruct((B, N_OUTPUT), jnp.float32),
        grid=grid,
        in_specs=[
            pl.BlockSpec((TB, n_in), lambda i: (i, 0)),     # x: tiled on batch
            resident((n_in, LANE)), resident((1, LANE)),    # w1, b1 (VMEM resident)
            resident((LANE, LANE)), resident((1, LANE)),    # w2, b2
            resident((1, LANE)),    resident((1, 1)),       # w3^T row, b3 scalar
        ],
        # width-1, lane-contiguous output block: no padded writeback to HBM
        out_specs=pl.BlockSpec((TB, N_OUTPUT), lambda i: (i, 0)),
        compiler_params=pltpu.CompilerParams(
            dimension_semantics=("parallel",),
        ),
    )(x.astype(jnp.float32), w1p, b1p, w2p, b2p, w3tp, b3p)


def init_params(key, n_input):
    """Deterministic init mirroring nn.Linear's default U(-1/sqrt(fan_in), +)."""
    ks = jax.random.split(key, 6)

    def linear(kw, kb, fan_in, fan_out):
        bound = 1.0 / jnp.sqrt(jnp.float32(fan_in))
        w = jax.random.uniform(kw, (fan_in, fan_out), jnp.float32, -bound, bound)
        b = jax.random.uniform(kb, (1, fan_out), jnp.float32, -bound, bound)
        return w, b

    w1, b1 = linear(ks[0], ks[1], n_input, N_HIDDEN1)
    w2, b2 = linear(ks[2], ks[3], N_HIDDEN1, N_HIDDEN2)
    w3, b3 = linear(ks[4], ks[5], N_HIDDEN2, N_OUTPUT)
    return w1, b1, w2, b2, w3, b3


def _reference(X, params):
    w1, b1, w2, b2, w3, b3 = params
    return jax.nn.sigmoid(
        jnp.maximum(jnp.maximum(X @ w1 + b1, 0.0) @ w2 + b2, 0.0) @ w3 + b3
    )


if __name__ == "__main__":
    key = jax.random.PRNGKey(0)
    k_x, k_x2, k_p = jax.random.split(key, 3)

    n_input = 16  # X.shape[1] in the original script; chosen small here
    params = init_params(k_p, n_input)
    padded = pad_params(*params)          # padded once, reused across calls

    # --- small batch (single grid step) ---------------------------------------
    batch = 8
    X = jax.random.uniform(k_x, (batch, n_input), jnp.float32, 0.0, 5.0)
    X = X / jnp.max(X)  # replicate the script's preprocessing X = X / X.max()

    out = jax.block_until_ready(network_forward(X, *padded))
    ref = _reference(X, params)
    assert out.shape == (batch, 1)
    assert jnp.allclose(out, ref, atol=1e-5), "mismatch vs reference (small batch)"

    # --- larger batch: multi-step 'parallel' grid + ragged last block ---------
    batch2 = 1530  # not a multiple of the chosen TB -> exercises OOB-row masking
    X2 = jax.random.uniform(k_x2, (batch2, n_input), jnp.float32, 0.0, 5.0)
    X2 = X2 / jnp.max(X2)

    out2 = jax.block_until_ready(network_forward(X2, *padded))
    ref2 = _reference(X2, params)
    assert out2.shape == (batch2, 1)
    assert jnp.allclose(out2, ref2, atol=1e-5), "mismatch vs reference (large batch)"

    print("KERNEL_OK")
</pallas_src>

<mosaic_0001>
module attributes {stable_mosaic.version = 11 : i64} {
  func.func @_mlp_kernel(%arg0: i32, %arg1: memref<8x16xf32, #tpu.memory_space<vmem>>, %arg2: memref<16x128xf32, #tpu.memory_space<vmem>>, %arg3: memref<1x128xf32, #tpu.memory_space<vmem>>, %arg4: memref<128x128xf32, #tpu.memory_space<vmem>>, %arg5: memref<1x128xf32, #tpu.memory_space<vmem>>, %arg6: memref<1x128xf32, #tpu.memory_space<vmem>>, %arg7: memref<1x1xf32, #tpu.memory_space<vmem>>, %arg8: memref<8x1xf32, #tpu.memory_space<vmem>>) attributes {dimension_semantics = [#tpu.dimension_semantics<parallel>], iteration_bounds = array<i64: 1>, scalar_prefetch = 0 : i64, scratch_operands = 0 : i64, tpu.core_type = #tpu.core_type<tc>, window_params = [{transform_indices = @transform_0, window_bounds = array<i64: 8, 16>}, {pipeline_mode = #tpu.pipeline_mode<synchronous>, transform_indices = @transform_1, window_bounds = array<i64: 16, 128>}, {pipeline_mode = #tpu.pipeline_mode<synchronous>, transform_indices = @transform_2, window_bounds = array<i64: 1, 128>}, {pipeline_mode = #tpu.pipeline_mode<synchronous>, transform_indices = @transform_3, window_bounds = array<i64: 128, 128>}, {pipeline_mode = #tpu.pipeline_mode<synchronous>, transform_indices = @transform_4, window_bounds = array<i64: 1, 128>}, {pipeline_mode = #tpu.pipeline_mode<synchronous>, transform_indices = @transform_5, window_bounds = array<i64: 1, 128>}, {pipeline_mode = #tpu.pipeline_mode<synchronous>, transform_indices = @transform_6, window_bounds = array<i64: 1, 1>}, {transform_indices = @transform_7, window_bounds = array<i64: 8, 1>}]} {
    %c0 = arith.constant 0 : index
    %c0_0 = arith.constant 0 : index
    %0 = vector.load %arg1[%c0, %c0_0] : memref<8x16xf32, #tpu.memory_space<vmem>>, vector<8x16xf32>
    %c0_1 = arith.constant 0 : index
    %c0_2 = arith.constant 0 : index
    %1 = vector.load %arg2[%c0_1, %c0_2] : memref<16x128xf32, #tpu.memory_space<vmem>>, vector<16x128xf32>
    %cst = arith.constant dense<0.000000e+00> : vector<8x128xf32>
    %2 = tpu.matmul %0, %1, %cst {dimension_numbers = #tpu.dot_dimension_numbers<[1], [0], [0], [1], [0, 0, 1, 1], [], []>} : vector<8x16xf32>, vector<16x128xf32>, vector<8x128xf32> -> vector<8x128xf32>
    %c0_3 = arith.constant 0 : index
    %c0_4 = arith.constant 0 : index
    %3 = vector.load %arg3[%c0_3, %c0_4] : memref<1x128xf32, #tpu.memory_space<vmem>>, vector<1x128xf32>
    %4 = vector.broadcast %3 : vector<1x128xf32> to vector<8x128xf32>
    %5 = arith.addf %2, %4 : vector<8x128xf32>
    %cst_5 = arith.constant 0.000000e+00 : f32
    %6 = vector.broadcast %cst_5 : f32 to vector<8x128xf32>
    %7 = arith.maximumf %5, %6 : vector<8x128xf32>
    %c0_6 = arith.constant 0 : index
    %c0_7 = arith.constant 0 : index
    %8 = vector.load %arg4[%c0_6, %c0_7] : memref<128x128xf32, #tpu.memory_space<vmem>>, vector<128x128xf32>
    %cst_8 = arith.constant dense<0.000000e+00> : vector<8x128xf32>
    %9 = tpu.matmul %7, %8, %cst_8 {dimension_numbers = #tpu.dot_dimension_numbers<[1], [0], [0], [1], [0, 0, 1, 1], [], []>} : vector<8x128xf32>, vector<128x128xf32>, vector<8x128xf32> -> vector<8x128xf32>
    %c0_9 = arith.constant 0 : index
    %c0_10 = arith.constant 0 : index
    %10 = vector.load %arg5[%c0_9, %c0_10] : memref<1x128xf32, #tpu.memory_space<vmem>>, vector<1x128xf32>
    %11 = vector.broadcast %10 : vector<1x128xf32> to vector<8x128xf32>
    %12 = arith.addf %9, %11 : vector<8x128xf32>
    %cst_11 = arith.constant 0.000000e+00 : f32
    %13 = vector.broadcast %cst_11 : f32 to vector<8x128xf32>
    %14 = arith.maximumf %12, %13 : vector<8x128xf32>
    %c0_12 = arith.constant 0 : index
    %c0_13 = arith.constant 0 : index
    %15 = vector.load %arg6[%c0_12, %c0_13] : memref<1x128xf32, #tpu.memory_space<vmem>>, vector<1x128xf32>
    %16 = vector.broadcast %15 : vector<1x128xf32> to vector<8x128xf32>
    %17 = arith.mulf %14, %16 : vector<8x128xf32>
    %cst_14 = arith.constant dense<0.000000e+00> : vector<8xf32>
    %18 = vector.multi_reduction <add>, %17, %cst_14 [1] : vector<8x128xf32> to vector<8xf32>
    %19 = vector.shape_cast %18 : vector<8xf32> to vector<8x1xf32>
    %c0_15 = arith.constant 0 : index
    %c0_16 = arith.constant 0 : index
    %20 = vector.load %arg7[%c0_15, %c0_16] : memref<1x1xf32, #tpu.memory_space<vmem>>, vector<1x1xf32>
    %21 = vector.broadcast %20 : vector<1x1xf32> to vector<8x1xf32>
    %22 = arith.addf %19, %21 : vector<8x1xf32>
    %23 = arith.negf %22 : vector<8x1xf32>
    %24 = math.exp %23 : vector<8x1xf32>
    %cst_17 = arith.constant 1.000000e+00 : f32
    %25 = vector.broadcast %cst_17 : f32 to vector<8x1xf32>
    %26 = arith.addf %25, %24 : vector<8x1xf32>
    %27 = arith.divf %25, %26 : vector<8x1xf32>
    %c0_18 = arith.constant 0 : index
    %c0_19 = arith.constant 0 : index
    %28 = vector.load %arg8[%c0_18, %c0_19] : memref<8x1xf32, #tpu.memory_space<vmem>>, vector<8x1xf32>
    tpu.vector_store %arg8[%c0_18, %c0_19], %27 {strides = array<i32>} : memref<8x1xf32, #tpu.memory_space<vmem>>, vector<8x1xf32>,
    return
  }
  func.func @transform_0(%arg0: i32) -> (i32, i32) {
    %c0_i32 = arith.constant 0 : i32
    %c0_i32_0 = arith.constant 0 : i32
    return %arg0, %c0_i32 : i32, i32
  }
  func.func @transform_1(%arg0: i32) -> (i32, i32) {
    %c0_i32 = arith.constant 0 : i32
    %c0_i32_0 = arith.constant 0 : i32
    %c0_i32_1 = arith.constant 0 : i32
    return %c0_i32, %c0_i32_0 : i32, i32
  }
  func.func @transform_2(%arg0: i32) -> (i32, i32) {
    %c0_i32 = arith.constant 0 : i32
    %c0_i32_0 = arith.constant 0 : i32
    %c0_i32_1 = arith.constant 0 : i32
    return %c0_i32, %c0_i32_0 : i32, i32
  }
  func.func @transform_3(%arg0: i32) -> (i32, i32) {
    %c0_i32 = arith.constant 0 : i32
    %c0_i32_0 = arith.constant 0 : i32
    %c0_i32_1 = arith.constant 0 : i32
    return %c0_i32, %c0_i32_0 : i32, i32
  }
  func.func @transform_4(%arg0: i32) -> (i32, i32) {
    %c0_i32 = arith.constant 0 : i32
    %c0_i32_0 = arith.constant 0 : i32
    %c0_i32_1 = arith.constant 0 : i32
    return %c0_i32, %c0_i32_0 : i32, i32
  }
  func.func @transform_5(%arg0: i32) -> (i32, i32) {
    %c0_i32 = arith.constant 0 : i32
    %c0_i32_0 = arith.constant 0 : i32
    %c0_i32_1 = arith.constant 0 : i32
    return %c0_i32, %c0_i32_0 : i32, i32
  }
  func.func @transform_6(%arg0: i32) -> (i32, i32) {
    %c0_i32 = arith.constant 0 : i32
    %c0_i32_0 = arith.constant 0 : i32
    %c0_i32_1 = arith.constant 0 : i32
    return %c0_i32, %c0_i32_0 : i32, i32
  }
  func.func @transform_7(%arg0: i32) -> (i32, i32) {
    %c0_i32 = arith.constant 0 : i32
    %c0_i32_0 = arith.constant 0 : i32
    return %arg0, %c0_i32 : i32, i32
  }
}

</mosaic_0001>

<bundles_post_ra>
// kernel: network_forward.1
= control target key start
LH: loop header
LB: loop body
LE: loop exit
PB: predicated region body
PF: predicated region fallthrough
CT: control target
= control target key end

     0   :  { %s345_s0 = inlined_call_operand.hbm [shape: f32[8,16], index: 0, kind: input, shape index: {}]   ;;  %s346_s1 = inlined_call_operand.hbm [shape: f32[16,128], index: 1, kind: input, shape index: {}]   ;;  %s347_s2 = inlined_call_operand.vmem [shape: f32[1,128], index: 2, kind: input, shape index: {}]   ;;  %s348_s3 = inlined_call_operand.hbm [shape: f32[128,128], index: 3, kind: input, shape index: {}]   ;;  %s349_s4 = inlined_call_operand.vmem [shape: f32[1,128], index: 4, kind: input, shape index: {}]   ;;  %s350_s5 = inlined_call_operand.vmem [shape: f32[1,128], index: 5, kind: input, shape index: {}]   ;;  %s351_s6 = inlined_call_operand.<no memory space> [shape: f32[1,1], index: 6, kind: input, shape index: {}]   ;;  %s352_s7 = inlined_call_operand.vmem [shape: f32[8,1], index: 7, kind: output, shape index: {}]  }
   0x1   :  { %v12_v0 = vstv %s351_s6 }
   0x2   :  { %13 = vst [vmem:[#allocation2] sm:$0x1] %v12_v0 }
   0x3   :  { %14 = vsyncpa [#allocation4], 0 }
   0x4   :  { %15 = vsyncpa [#allocation6], 0  ;;  %s31_s28 = sshll.u32 %s346_s1, 4  ;;  %s276_s29 = smov [#allocation5]   ;;  %s32_s28 = int_to_ptr.hbm [resolvable:$true] %s31_s28 }
   0x5   :  { %s33_s30 = sshll.u32 %s276_s29, 4  ;;  %s21_s10 = sshll.u32 %s345_s0, 4  ;;  %s34_s30 = int_to_ptr.vmem [resolvable:$true] %s33_s30  ;;  %s22_s10 = int_to_ptr.hbm [resolvable:$true] %s21_s10 }
   0x6   :  { %s277_s11 = smov 128   ;;  %s278_s12 = smov 8  }
   0x7   :  { %39 = dma.hbm_to_vmem [thread:$0]  %s32_s28, 256, %s34_s30, [#allocation6], %s277_s11, %s277_s11, %s278_s12  }
   0x8   :  { %s279_s6 = smov [#allocation3]   ;;  %s46_s16 = sshll.u32 %s348_s3, 4  ;;  %s47_s16 = int_to_ptr.hbm [resolvable:$true] %s46_s16 }
   0x9   :  { %s23_s13 = sshll.u32 %s279_s6, 4  ;;  %s280_s1 = smov [#allocation7]   ;;  %s24_s13 = int_to_ptr.vmem [resolvable:$true] %s23_s13 }
   0xa   :  { %26 = dma.hbm_to_vmem [thread:$0]  %s22_s10, 128, %s24_s13, [#allocation4]  }
   0xb   :  { %s48_s17 = sshll.u32 %s280_s1, 4  ;;  %s49_s17 = int_to_ptr.vmem [resolvable:$true] %s48_s17 }
   0xc   :  { %54 = dma.hbm_to_vmem [thread:$0]  %s47_s16, 2048, %s49_s17, [#allocation6], %s277_s11, %s277_s11, %s278_s12  }
   0xd   :  { %272 = dma.done.wait [#allocation4], 128  }
   0xe   :  { %273 = vsyncadd [#allocation4], 4294967168 }
   0xf   :  { %274 = dma.done.wait [#allocation6], 2304  }
  0x10   :  { %275 = vsyncadd [#allocation6], 4294964992  ;;  %v75_v1 = vld [vmem:[#allocation5 + $0x8] sm:$0xff]  ;;  %v74_v2 = vld [vmem:[#allocation5] sm:$0xff]  ;;  %vm80_vm0 = vcmask 130048   ;;  %vm177_vm4 = vcmask 7168  }
  0x11   :  { %98 = vmatpush.msra.mxu0 %v75_v1  ;;  %v73_v3 = vld [vmem:[#allocation3] sm:$0xff]  ;;  %v120_v4 = vld [vmem:[#allocation7 + $0x78] sm:$0xff]  ;;  %v119_v5 = vld [vmem:[#allocation7 + $0x70] sm:$0xff] }
  0x12   :  { %125 = vmatpush.msra.mxu1 %v120_v4  ;;  %v118_v6 = vld [vmem:[#allocation7 + $0x68] sm:$0xff]  ;;  %v117_v7 = vld [vmem:[#allocation7 + $0x60] sm:$0xff]  ;;  %v116_v8 = vld [vmem:[#allocation7 + $0x58] sm:$0xff] }
  0x13   :  { %99 = vmatpush.msra.mxu0 %v74_v2  ;;  %v115_v9 = vld [vmem:[#allocation7 + $0x50] sm:$0xff]  ;;  %v114_v10 = vld [vmem:[#allocation7 + $0x48] sm:$0xff]  ;;  %v113_v11 = vld [vmem:[#allocation7 + $0x40] sm:$0xff] }
  0x14   :  { %185 = vmatmul.msk.f32.vlgmr.msra.gmra.mxu0 %vm80_vm0, %v73_v3  ;;  %126 = vmatpush.msra.mxu1 %v119_v5  ;;  %v112_v12 = vld [vmem:[#allocation7 + $0x38] sm:$0xff]  ;;  %v111_v13 = vld [vmem:[#allocation7 + $0x30] sm:$0xff]  ;;  %v110_v14 = vld [vmem:[#allocation7 + $0x28] sm:$0xff] }
  0x15   :  { %v109_v15 = vld [vmem:[#allocation7 + $0x20] sm:$0xff]  ;;  %v108_v16 = vld [vmem:[#allocation7 + $0x18] sm:$0xff]  ;;  %v107_v17 = vld [vmem:[#allocation7 + $0x10] sm:$0xff] }
  0x16   :  { %127 = vmatpush.msra.mxu1 %v118_v6  ;;  %v106_v18 = vld [vmem:[#allocation7 + $0x8] sm:$0xff]  ;;  %v105_v19 = vld [vmem:[#allocation7] sm:$0xff] }
  0x17   :  { %v192_v20 = vld [vmem:[%s347_s2] ss:$0 sm:$0xff] }
  0x18   :  { %128 = vmatpush.msra.mxu1 %v117_v7  ;;  %v193_v24 = vld [vmem:[%s349_s4] ss:$0 sm:$0xff] }
  0x19   :  { %v194_v27 = vld [vmem:[%s350_s5] ss:$0 sm:$0xff] }
  0x1a   :  { %129 = vmatpush.msra.mxu1 %v116_v8  ;;  %v195_v30 = vld [vmem:[#allocation2] ss:$0 sm:$0xff] }
  0x1c   :  { %130 = vmatpush.msra.mxu1 %v115_v9 }
  0x1e   :  { %131 = vmatpush.msra.mxu1 %v114_v10 }
  0x20   :  { %132 = vmatpush.msra.mxu1 %v113_v11 }
  0x22   :  { %133 = vmatpush.msra.mxu1 %v112_v12 }
  0x24   :  { %134 = vmatpush.msra.mxu1 %v111_v13 }
  0x26   :  { %135 = vmatpush.msra.mxu1 %v110_v14 }
  0x28   :  { %136 = vmatpush.msra.mxu1 %v109_v15 }
  0x2a   :  { %137 = vmatpush.msra.mxu1 %v108_v16 }
  0x2c   :  { %138 = vmatpush.msra.mxu1 %v107_v17 }
  0x2e   :  { %139 = vmatpush.msra.mxu1 %v106_v18 }
  0x30   :  { %140 = vmatpush.msra.mxu1 %v105_v19 }
  0x91   :  { %v101_v21 = vpop.f32.mrf.mxu0 }
  0x92   :  { %v102_v22 = vadd.f32 %v192_v20, %v101_v21 }
  0x94   :  { %v104_v23 = vmax.f32 %v102_v22, 0.0 }
  0x96   :  { %141 = vmatmul.f32.vlgmr.msra.gmra.mxu1 %v104_v23 }
 0x113   :  { %v142_v25 = vpop.f32.mrf.mxu1 }
 0x114   :  { %v143_v26 = vadd.f32 %v193_v24, %v142_v25 }
 0x116   :  { %v145_v28 = vmax.f32 %v143_v26, 0.0 }
 0x118   :  { %v150_v29 = vmul.f32 %v194_v27, %v145_v28 }
 0x11a   :  { %151 = vadd.xlane.f32.xlu0 %v150_v29 }
 0x18d   :  { %v152_v31 = vpop.xlane.xlu0 %151 }
 0x18e   :  { %v157_v32 = vadd.f32 %v195_v30, %v152_v31 }
 0x190   :  { %v186_v33 = vmul.f32 -1.442695, %v157_v32 }
 0x192   :  { %196 = vpow2.f32 %v186_v33 }
 0x198   :  { %v197_v34 = vpop.eup %196 }
 0x199   :  { %v161_v35 = vadd.f32 1.0, %v197_v34 }
 0x19b   :  { %198 = vrcp.f32 %v161_v35  ;;  %v173_v39 = vand.u32 2147483648, %v161_v35  ;;  %v171_v41 = vand.u32 2147483647, %v161_v35  ;;  %vm167_vm2 = vweird.f32 %v161_v35 }
 0x19d   :  { %v174_v43 = vor.u32 1.1754944e-38, %v173_v39  ;;  %vm172_vm5 = vcmp.eq.f32.partialorder %v171_v41, 8.507059e+37 }
 0x1a1   :  { %v199_v36 = vpop.eup %198 }
 0x1a2   :  { %v163_v37 = vmul.f32 %v199_v36, %v161_v35  ;;  %vm168_vm1 = vweird.f32 %v199_v36 }
 0x1a3   :  { %vm169_vm3 = vmor %vm167_vm2, %vm168_vm1 }
 0x1a4   :  { %v164_v38 = vsub.f32 1.0, %v163_v37 }
 0x1a6   :  { %v165_v40 = vmul.f32 %v199_v36, %v164_v38 }
 0x1a8   :  { %v166_v42 = vadd.f32 %v199_v36, %v165_v40 }
 0x1aa   :  { %v170_v44 = vsel %vm169_vm3, %v199_v36, %v166_v42 }
 0x1ab   :  { %v175_v45 = vsel %vm172_vm5, %v174_v43, %v170_v44 }
 0x1ac   :  { %178 = vst.msk [vmem:[%s352_s7] sm:$0xff] %vm177_vm4, %v175_v45 }
 0x1ad   :  { %183 = vsyncpa [#allocation4], 1 }
 0x1ae   :  { %184 = vsyncpa [#allocation6], 1 }

</bundles_post_ra>
